<compile_context>
chip_gen: v5e
topology: v5e:2x2
jax: 0.10.0
libtpu: 0.0.40
codegen_flags: <defaults>
</compile_context>

<pallas_src>
import functools

import jax
import jax.numpy as jnp
from jax.experimental import pallas as pl
from jax.experimental.pallas import tpu as pltpu

GRID_RANGE = 2.0  # B-spline knots span [-GRID_RANGE, GRID_RANGE]
# TODO(synk): exact BSplineActivation (external module) init / out-of-range
# extrapolation rule not given; using linear "hat" bases on evenly spaced knots
# over [-GRID_RANGE, GRID_RANGE], zero outside the knot support.


def _round_up(x, m):
    return (x + m - 1) // m * m


def _kan_kernel(x_ref, w_ref, bias_ref, out_ref, *, grid_size, grid_h):
    """One (TB, TF) output tile: out = silu(x) @ W[0] + sum_k basis_k(x) @ W[1+k] + bias.

    x_ref:    (TB, K)               batch tile of X (K = padded in_features)
    w_ref:    (grid_size+1, K, TF)  one-hot selection weights (silu + per-knot)
    bias_ref: (1, TF)
    out_ref:  (TB, TF)
    """
    x = x_ref[...].astype(jnp.float32)                       # (TB, K)

    # SiLU via tanh-form sigmoid: EUP tanh instead of an f32 divide on the VPU.
    silu = x * (0.5 * jnp.tanh(0.5 * x) + 0.5)
    acc = jnp.dot(silu, w_ref[0],
                  preferred_element_type=jnp.float32,
                  precision=jax.lax.Precision.HIGHEST)        # (TB, TF)

    # Degree-1 B-spline (hat) bases on scaled coords u = x / h; knots sit at the
    # integers k - (G-1)/2, so 1/h is hoisted out of the knot loop.
    u = x * (1.0 / grid_h)
    half = (grid_size - 1) / 2.0
    for k in range(grid_size):                                # grid_size is tiny
        basis = jnp.maximum(0.0, 1.0 - jnp.abs(u - (k - half)))
        acc = acc + jnp.dot(basis, w_ref[1 + k],
                            preferred_element_type=jnp.float32,
                            precision=jax.lax.Precision.HIGHEST)

    out_ref[...] = (acc + bias_ref[...]).astype(out_ref.dtype)


def kan_layer_forward(X, coeffs, w_silu, w_spline, bias, *, tile_b=512, tile_f=512):
    """X: (B, in_features). coeffs: (grid_size, out_features).
    w_silu / w_spline / bias: (1, out_features).  Returns (B, out_features)."""
    B, in_features = X.shape
    grid_size, out_features = coeffs.shape
    grid_h = 2.0 * GRID_RANGE / (grid_size - 1)

    # ---- TPU-friendly padded sizes & tiles (lane-dense output, (8,128) rule).
    K_pad = _round_up(in_features, 8)
    F_pad = _round_up(out_features, 128)
    B_pad = _round_up(B, 8)
    TF = min(tile_f, F_pad)
    while F_pad % TF:
        TF -= 128
    TB = min(tile_b, B_pad)
    while B_pad % TB:
        TB -= 8

    # ---- Fold the j -> j % in_features wiring and the per-edge linear weights
    # into one-hot selection matrices (tiny; precompute once in real use):
    #   W[0,   c, j] = w_silu[j]                * (c == j % in_features)
    #   W[1+k, c, j] = w_spline[j] * coeffs[k,j]* (c == j % in_features)
    onehot = (jnp.arange(out_features)[None, :] % in_features
              == jnp.arange(in_features)[:, None]).astype(jnp.float32)      # (in, F)
    cs = (coeffs * w_spline).astype(jnp.float32)                             # (G, F)
    W = jnp.concatenate(
        [(w_silu.astype(jnp.float32) * onehot)[None],                        # (1, in, F)
         cs[:, None, :] * onehot[None]],                                     # (G, in, F)
        axis=0)                                                              # (G+1, in, F)
    W = jnp.pad(W, ((0, 0), (0, K_pad - in_features), (0, F_pad - out_features)))
    bias_p = jnp.pad(bias.astype(jnp.float32), ((0, 0), (0, F_pad - out_features)))
    Xp = jnp.pad(X, ((0, B_pad - B), (0, K_pad - in_features)))

    kernel = functools.partial(_kan_kernel, grid_size=grid_size, grid_h=grid_h)
    out = pl.pallas_call(
        kernel,
        out_shape=jax.ShapeDtypeStruct((B_pad, F_pad), X.dtype),
        # Batch axis is innermost, so the W / bias blocks (index depends only on
        # the out-feature tile) stay resident across the inner loop.
        grid=(F_pad // TF, B_pad // TB),
        in_specs=[
            pl.BlockSpec((TB, K_pad), lambda jf, ib: (ib, 0)),
            pl.BlockSpec((grid_size + 1, K_pad, TF), lambda jf, ib: (0, 0, jf)),
            pl.BlockSpec((1, TF), lambda jf, ib: (0, jf)),
        ],
        out_specs=pl.BlockSpec((TB, TF), lambda jf, ib: (ib, jf)),
        compiler_params=pltpu.CompilerParams(
            dimension_semantics=("parallel", "parallel"),
            vmem_limit_bytes=32 * 1024 * 1024,
        ),
    )(Xp, W, bias_p)

    if (B_pad, F_pad) != (B, out_features):
        out = out[:B, :out_features]
    return out


def _reference(X, coeffs, w_silu, w_spline, bias):
    """Pure-JAX, purely elementwise reference of the same forward."""
    grid_size, out_features = coeffs.shape
    in_features = X.shape[1]
    grid_h = 2.0 * GRID_RANGE / (grid_size - 1)
    idx = jnp.arange(out_features) % in_features
    xg = X[:, idx].astype(jnp.float32)                                     # (B, F)
    silu = xg * jax.nn.sigmoid(xg)
    knots = (jnp.arange(grid_size) - (grid_size - 1) / 2.0) * grid_h
    basis = jnp.maximum(0.0, 1.0 - jnp.abs(xg[..., None] - knots) / grid_h)  # (B,F,G)
    spline = jnp.sum(basis * coeffs.T[None, :, :], axis=-1)
    return (w_silu * silu + w_spline * spline + bias).astype(X.dtype)


if __name__ == "__main__":
    B, in_features, out_features, grid_size = 8, 4, 8, 5  # grid_size odd (as in module)

    key = jax.random.PRNGKey(0)
    k1, k2, k3, k4 = jax.random.split(key, 4)

    X = jax.random.normal(k1, (B, in_features), jnp.float32)

    # Per-edge B-spline coefficients over knots on [-GRID_RANGE, GRID_RANGE].
    coeffs = 0.1 * jax.random.normal(k2, (grid_size, out_features), jnp.float32)

    # nn.Linear(2, 1) per edge: weight (1, 2) -> split into silu / spline weights.
    bound = 1.0 / jnp.sqrt(2.0)
    Wlin = jax.random.uniform(k3, (out_features, 2), jnp.float32, -bound, bound)
    bvec = jax.random.uniform(k4, (out_features,), jnp.float32, -bound, bound)
    w_silu = Wlin[:, 0].reshape(1, out_features)
    w_spline = Wlin[:, 1].reshape(1, out_features)
    bias = bvec.reshape(1, out_features)

    y = kan_layer_forward(X, coeffs, w_silu, w_spline, bias)
    jax.block_until_ready(y)

    y_ref = _reference(X, coeffs, w_silu, w_spline, bias)
    assert y.shape == (B, out_features)
    assert jnp.allclose(y, y_ref, atol=3e-5, rtol=3e-5), "mismatch vs reference"

    print("KERNEL_OK")
</pallas_src>

<mosaic_0001>
module attributes {stable_mosaic.version = 11 : i64} {
  func.func @_kan_kernel(%arg0: i32, %arg1: i32, %arg2: memref<8x8xf32, #tpu.memory_space<vmem>>, %arg3: memref<6x8x128xf32, #tpu.memory_space<vmem>>, %arg4: memref<1x128xf32, #tpu.memory_space<vmem>>, %arg5: memref<8x128xf32, #tpu.memory_space<vmem>>) attributes {dimension_semantics = [#tpu.dimension_semantics<parallel>, #tpu.dimension_semantics<parallel>], iteration_bounds = array<i64: 1, 1>, scalar_prefetch = 0 : i64, scratch_operands = 0 : i64, tpu.core_type = #tpu.core_type<tc>, window_params = [{transform_indices = @transform_0, window_bounds = array<i64: 8, 8>}, {transform_indices = @transform_1, window_bounds = array<i64: 6, 8, 128>}, {transform_indices = @transform_2, window_bounds = array<i64: 1, 128>}, {transform_indices = @transform_3, window_bounds = array<i64: 8, 128>}]} {
    %c0 = arith.constant 0 : index
    %c0_0 = arith.constant 0 : index
    %0 = vector.load %arg2[%c0, %c0_0] : memref<8x8xf32, #tpu.memory_space<vmem>>, vector<8x8xf32>
    %cst = arith.constant 5.000000e-01 : f32
    %1 = vector.broadcast %cst : f32 to vector<8x8xf32>
    %2 = arith.mulf %1, %0 : vector<8x8xf32>
    %3 = math.tanh %2 : vector<8x8xf32>
    %cst_1 = arith.constant 5.000000e-01 : f32
    %4 = vector.broadcast %cst_1 : f32 to vector<8x8xf32>
    %5 = arith.mulf %4, %3 : vector<8x8xf32>
    %cst_2 = arith.constant 5.000000e-01 : f32
    %6 = vector.broadcast %cst_2 : f32 to vector<8x8xf32>
    %7 = arith.addf %5, %6 : vector<8x8xf32>
    %8 = arith.mulf %0, %7 : vector<8x8xf32>
    %c0_3 = arith.constant 0 : index
    %c0_4 = arith.constant 0 : index
    %c0_5 = arith.constant 0 : index
    %9 = vector.load %arg3[%c0_3, %c0_4, %c0_5] : memref<6x8x128xf32, #tpu.memory_space<vmem>>, vector<1x8x128xf32>
    %10 = vector.shape_cast %9 : vector<1x8x128xf32> to vector<8x128xf32>
    %cst_6 = arith.constant dense<0.000000e+00> : vector<8x128xf32>
    %11 = tpu.matmul %8, %10, %cst_6 {dimension_numbers = #tpu.dot_dimension_numbers<[1], [0], [0], [1], [0, 0, 1, 1], [], []>, precision = #tpu.contract_precision<fp32>} : vector<8x8xf32>, vector<8x128xf32>, vector<8x128xf32> -> vector<8x128xf32>
    %cst_7 = arith.constant 1.000000e+00 : f32
    %12 = vector.broadcast %cst_7 : f32 to vector<8x8xf32>
    %13 = arith.mulf %0, %12 : vector<8x8xf32>
    %cst_8 = arith.constant -2.000000e+00 : f32
    %14 = vector.broadcast %cst_8 : f32 to vector<8x8xf32>
    %15 = arith.subf %13, %14 : vector<8x8xf32>
    %16 = math.absf %15 : vector<8x8xf32>
    %cst_9 = arith.constant 1.000000e+00 : f32
    %17 = vector.broadcast %cst_9 : f32 to vector<8x8xf32>
    %18 = arith.subf %17, %16 : vector<8x8xf32>
    %cst_10 = arith.constant 0.000000e+00 : f32
    %19 = vector.broadcast %cst_10 : f32 to vector<8x8xf32>
    %20 = arith.maximumf %19, %18 : vector<8x8xf32>
    %c1 = arith.constant 1 : index
    %c0_11 = arith.constant 0 : index
    %c0_12 = arith.constant 0 : index
    %21 = vector.load %arg3[%c1, %c0_11, %c0_12] : memref<6x8x128xf32, #tpu.memory_space<vmem>>, vector<1x8x128xf32>
    %22 = vector.shape_cast %21 : vector<1x8x128xf32> to vector<8x128xf32>
    %cst_13 = arith.constant dense<0.000000e+00> : vector<8x128xf32>
    %23 = tpu.matmul %20, %22, %cst_13 {dimension_numbers = #tpu.dot_dimension_numbers<[1], [0], [0], [1], [0, 0, 1, 1], [], []>, precision = #tpu.contract_precision<fp32>} : vector<8x8xf32>, vector<8x128xf32>, vector<8x128xf32> -> vector<8x128xf32>
    %24 = arith.addf %11, %23 : vector<8x128xf32>
    %cst_14 = arith.constant -1.000000e+00 : f32
    %25 = vector.broadcast %cst_14 : f32 to vector<8x8xf32>
    %26 = arith.subf %13, %25 : vector<8x8xf32>
    %27 = math.absf %26 : vector<8x8xf32>
    %cst_15 = arith.constant 1.000000e+00 : f32
    %28 = vector.broadcast %cst_15 : f32 to vector<8x8xf32>
    %29 = arith.subf %28, %27 : vector<8x8xf32>
    %cst_16 = arith.constant 0.000000e+00 : f32
    %30 = vector.broadcast %cst_16 : f32 to vector<8x8xf32>
    %31 = arith.maximumf %30, %29 : vector<8x8xf32>
    %c2 = arith.constant 2 : index
    %c0_17 = arith.constant 0 : index
    %c0_18 = arith.constant 0 : index
    %32 = vector.load %arg3[%c2, %c0_17, %c0_18] : memref<6x8x128xf32, #tpu.memory_space<vmem>>, vector<1x8x128xf32>
    %33 = vector.shape_cast %32 : vector<1x8x128xf32> to vector<8x128xf32>
    %cst_19 = arith.constant dense<0.000000e+00> : vector<8x128xf32>
    %34 = tpu.matmul %31, %33, %cst_19 {dimension_numbers = #tpu.dot_dimension_numbers<[1], [0], [0], [1], [0, 0, 1, 1], [], []>, precision = #tpu.contract_precision<fp32>} : vector<8x8xf32>, vector<8x128xf32>, vector<8x128xf32> -> vector<8x128xf32>
    %35 = arith.addf %24, %34 : vector<8x128xf32>
    %cst_20 = arith.constant 0.000000e+00 : f32
    %36 = vector.broadcast %cst_20 : f32 to vector<8x8xf32>
    %37 = arith.subf %13, %36 : vector<8x8xf32>
    %38 = math.absf %37 : vector<8x8xf32>
    %cst_21 = arith.constant 1.000000e+00 : f32
    %39 = vector.broadcast %cst_21 : f32 to vector<8x8xf32>
    %40 = arith.subf %39, %38 : vector<8x8xf32>
    %cst_22 = arith.constant 0.000000e+00 : f32
    %41 = vector.broadcast %cst_22 : f32 to vector<8x8xf32>
    %42 = arith.maximumf %41, %40 : vector<8x8xf32>
    %c3 = arith.constant 3 : index
    %c0_23 = arith.constant 0 : index
    %c0_24 = arith.constant 0 : index
    %43 = vector.load %arg3[%c3, %c0_23, %c0_24] : memref<6x8x128xf32, #tpu.memory_space<vmem>>, vector<1x8x128xf32>
    %44 = vector.shape_cast %43 : vector<1x8x128xf32> to vector<8x128xf32>
    %cst_25 = arith.constant dense<0.000000e+00> : vector<8x128xf32>
    %45 = tpu.matmul %42, %44, %cst_25 {dimension_numbers = #tpu.dot_dimension_numbers<[1], [0], [0], [1], [0, 0, 1, 1], [], []>, precision = #tpu.contract_precision<fp32>} : vector<8x8xf32>, vector<8x128xf32>, vector<8x128xf32> -> vector<8x128xf32>
    %46 = arith.addf %35, %45 : vector<8x128xf32>
    %cst_26 = arith.constant 1.000000e+00 : f32
    %47 = vector.broadcast %cst_26 : f32 to vector<8x8xf32>
    %48 = arith.subf %13, %47 : vector<8x8xf32>
    %49 = math.absf %48 : vector<8x8xf32>
    %cst_27 = arith.constant 1.000000e+00 : f32
    %50 = vector.broadcast %cst_27 : f32 to vector<8x8xf32>
    %51 = arith.subf %50, %49 : vector<8x8xf32>
    %cst_28 = arith.constant 0.000000e+00 : f32
    %52 = vector.broadcast %cst_28 : f32 to vector<8x8xf32>
    %53 = arith.maximumf %52, %51 : vector<8x8xf32>
    %c4 = arith.constant 4 : index
    %c0_29 = arith.constant 0 : index
    %c0_30 = arith.constant 0 : index
    %54 = vector.load %arg3[%c4, %c0_29, %c0_30] : memref<6x8x128xf32, #tpu.memory_space<vmem>>, vector<1x8x128xf32>
    %55 = vector.shape_cast %54 : vector<1x8x128xf32> to vector<8x128xf32>
    %cst_31 = arith.constant dense<0.000000e+00> : vector<8x128xf32>
    %56 = tpu.matmul %53, %55, %cst_31 {dimension_numbers = #tpu.dot_dimension_numbers<[1], [0], [0], [1], [0, 0, 1, 1], [], []>, precision = #tpu.contract_precision<fp32>} : vector<8x8xf32>, vector<8x128xf32>, vector<8x128xf32> -> vector<8x128xf32>
    %57 = arith.addf %46, %56 : vector<8x128xf32>
    %cst_32 = arith.constant 2.000000e+00 : f32
    %58 = vector.broadcast %cst_32 : f32 to vector<8x8xf32>
    %59 = arith.subf %13, %58 : vector<8x8xf32>
    %60 = math.absf %59 : vector<8x8xf32>
    %cst_33 = arith.constant 1.000000e+00 : f32
    %61 = vector.broadcast %cst_33 : f32 to vector<8x8xf32>
    %62 = arith.subf %61, %60 : vector<8x8xf32>
    %cst_34 = arith.constant 0.000000e+00 : f32
    %63 = vector.broadcast %cst_34 : f32 to vector<8x8xf32>
    %64 = arith.maximumf %63, %62 : vector<8x8xf32>
    %c5 = arith.constant 5 : index
    %c0_35 = arith.constant 0 : index
    %c0_36 = arith.constant 0 : index
    %65 = vector.load %arg3[%c5, %c0_35, %c0_36] : memref<6x8x128xf32, #tpu.memory_space<vmem>>, vector<1x8x128xf32>
    %66 = vector.shape_cast %65 : vector<1x8x128xf32> to vector<8x128xf32>
    %cst_37 = arith.constant dense<0.000000e+00> : vector<8x128xf32>
    %67 = tpu.matmul %64, %66, %cst_37 {dimension_numbers = #tpu.dot_dimension_numbers<[1], [0], [0], [1], [0, 0, 1, 1], [], []>, precision = #tpu.contract_precision<fp32>} : vector<8x8xf32>, vector<8x128xf32>, vector<8x128xf32> -> vector<8x128xf32>
    %68 = arith.addf %57, %67 : vector<8x128xf32>
    %c0_38 = arith.constant 0 : index
    %c0_39 = arith.constant 0 : index
    %69 = vector.load %arg4[%c0_38, %c0_39] : memref<1x128xf32, #tpu.memory_space<vmem>>, vector<1x128xf32>
    %70 = vector.broadcast %69 : vector<1x128xf32> to vector<8x128xf32>
    %71 = arith.addf %68, %70 : vector<8x128xf32>
    %c0_40 = arith.constant 0 : index
    %c0_41 = arith.constant 0 : index
    %72 = vector.load %arg5[%c0_40, %c0_41] : memref<8x128xf32, #tpu.memory_space<vmem>>, vector<8x128xf32>
    tpu.vector_store %arg5[%c0_40, %c0_41], %71 {strides = array<i32>} : memref<8x128xf32, #tpu.memory_space<vmem>>, vector<8x128xf32>,
    return
  }
  func.func @transform_0(%arg0: i32, %arg1: i32) -> (i32, i32) {
    %c0_i32 = arith.constant 0 : i32
    %c0_i32_0 = arith.constant 0 : i32
    return %arg1, %c0_i32 : i32, i32
  }
  func.func @transform_1(%arg0: i32, %arg1: i32) -> (i32, i32, i32) {
    %c0_i32 = arith.constant 0 : i32
    %c0_i32_0 = arith.constant 0 : i32
    %c0_i32_1 = arith.constant 0 : i32
    return %c0_i32, %c0_i32_0, %arg0 : i32, i32, i32
  }
  func.func @transform_2(%arg0: i32, %arg1: i32) -> (i32, i32) {
    %c0_i32 = arith.constant 0 : i32
    %c0_i32_0 = arith.constant 0 : i32
    return %c0_i32, %arg0 : i32, i32
  }
  func.func @transform_3(%arg0: i32, %arg1: i32) -> (i32, i32) {
    %c0_i32 = arith.constant 0 : i32
    return %arg1, %arg0 : i32, i32
  }
}

</mosaic_0001>

<bundles_post_ra>
// kernel: tpu_custom_call.1
= control target key start
LH: loop header
LB: loop body
LE: loop exit
PB: predicated region body
PF: predicated region fallthrough
CT: control target
= control target key end

     0   :  { %8 = vsyncpa [#allocation3], 0  ;;  %s1177_s0 = inlined_call_operand.hbm [shape: f32[8,8], index: 0, kind: input, shape index: {}]   ;;  %s1178_s1 = inlined_call_operand.hbm [shape: f32[6,8,128], index: 1, kind: input, shape index: {}]   ;;  %s1179_s2 = inlined_call_operand.vmem [shape: f32[1,128], index: 2, kind: input, shape index: {}]   ;;  %s1180_s3 = inlined_call_operand.hbm [shape: f32[8,128], index: 3, kind: output, shape index: {}]  }
   0x1   :  { %9 = vsyncpa [#allocation6], 0 }
   0x2   :  { %10 = vsyncpa [#allocation4], 0  ;;  %s16_s14 = sshll.u32 %s1177_s0, 4  ;;  %s1094_s15 = smov [#allocation2]   ;;  %s17_s14 = int_to_ptr.hbm [resolvable:$true] %s16_s14 }
   0x3   :  { %s18_s16 = sshll.u32 %s1094_s15, 4  ;;  %s26_s19 = sshll.u32 %s1178_s1, 4  ;;  %s19_s16 = int_to_ptr.vmem [resolvable:$true] %s18_s16  ;;  %s27_s19 = int_to_ptr.hbm [resolvable:$true] %s26_s19 }
   0x4   :  { %21 = dma.hbm_to_vmem [thread:$0]  %s17_s14, 128, %s19_s16, [#allocation3]  }
   0x5   :  { %s1095_s20 = smov [#allocation5]   ;;  %s1096_s22 = smov 128  }
   0x6   :  { %s28_s21 = sshll.u32 %s1095_s20, 4  ;;  %s1097_s23 = smov 8   ;;  %s29_s21 = int_to_ptr.vmem [resolvable:$true] %s28_s21 }
   0x7   :  { %34 = dma.hbm_to_vmem [thread:$0]  %s27_s19, 768, %s29_s21, [#allocation6], %s1096_s22, %s1096_s22, %s1097_s23  }
   0x8   :  { %1088 = dma.done.wait [#allocation3], 128  }
   0x9   :  { %1089 = vsyncadd [#allocation3], 4294967168 }
   0xa   :  { %1090 = dma.done.wait [#allocation6], 768  }
   0xb   :  { %1091 = vsyncadd [#allocation6], 4294966528  ;;  %v57_v0 = vld [vmem:[#allocation5 + $0x8] sm:$0xff]  ;;  %v1125_v1 = vld [vmem:[#allocation2] sm:$0xff]  ;;  %vm58_vm0 = vcmask 64512   ;;  %s1098_s24 = smov [#allocation7]  }
   0xc   :  { %v51_v2 = vld [vmem:[#allocation5] sm:$0xff]  ;;  %v77_v3 = vand.u32 4294901760, %v57_v0  ;;  %v1004_v4 = vadd.f32 2.0, %v1125_v1  ;;  %v46_v6 = vmul.f32 0.5, %v1125_v1  ;;  %v362_v7 = vld [vmem:[#allocation5 + $0x10] sm:$0xff]  ;;  %v1005_v12 = vadd.f32 1.0, %v1125_v1 }
   0xd   :  { %v226_v5 = vand.u32 4294901760, %v51_v2  ;;  %v1129_v8 = vand.u32 4294901760, %v362_v7  ;;  %v517_v28 = vld [vmem:[#allocation5 + $0x18] sm:$0xff]  ;;  %v513_v38 = vand.u32 2147483647, %v1125_v1  ;;  %v673_v54 = vld [vmem:[#allocation5 + $0x20] sm:$0xff] }
   0xe   :  { %v104_v9 = vsub.f32 %v57_v0, %v77_v3  ;;  %v53_v10 = vand.u32 2147483647, %v1004_v4  ;;  %154 = vmatpush.msra.mxu3 %v77_v3  ;;  %78 = vmatpush.msra.mxu0 %v77_v3  ;;  %1014 = vtanh.f32 %v46_v6  ;;  %v358_v20 = vand.u32 2147483647, %v1005_v12  ;;  %s991_s25 = sshll.u32 %s1098_s24, 4  ;;  %s993_s28 = sshll.u32 %s1180_s3, 4  ;;  %s992_s25 = int_to_ptr.vmem [resolvable:$true] %s991_s25  ;;  %s994_s28 = int_to_ptr.hbm [resolvable:$true] %s993_s28 }
   0xf   :  { %v253_v11 = vsub.f32 %v51_v2, %v226_v5  ;;  %v1133_v16 = vsub.f32 %v362_v7, %v1129_v8  ;;  %v1140_v33 = vand.u32 4294901760, %v517_v28  ;;  %v514_v45 = vsub.f32 1.0, %v513_v38  ;;  %v829_v2 = vld [vmem:[#allocation5 + $0x28] sm:$0xff] }
  0x10   :  { %131 = vmatpush.msra.mxu2 %v104_v9  ;;  %v54_v13 = vsub.f32 1.0, %v53_v10  ;;  %v105_v14 = vand.u32 4294901760, %v104_v9  ;;  %v359_v32 = vsub.f32 1.0, %v358_v20  ;;  %v692_v55 = vand.u32 4294901760, %v673_v54 }
  0x11   :  { %v254_v15 = vand.u32 4294901760, %v253_v11  ;;  %v409_v25 = vand.u32 4294901760, %v1133_v16  ;;  %v1146_v42 = vsub.f32 %v517_v28, %v1140_v33  ;;  %v515_v51 = vmax.f32 %v514_v45, 0.0 }
  0x12   :  { %227 = vmatpush.msrb.mxu2 %v226_v5  ;;  %v55_v17 = vmax.f32 %v54_v13, 0.0  ;;  %v106_v18 = vsub.f32 %v104_v9, %v105_v14  ;;  %180 = vmatpush.msrb.mxu0 %v105_v14  ;;  %v360_v41 = vmax.f32 %v359_v32, 0.0  ;;  %v1006_v59 = vadd.f32 -1.0, %v1125_v1 }
  0x13   :  { %v255_v19 = vsub.f32 %v253_v11, %v254_v15  ;;  %v410_v31 = vsub.f32 %v1133_v16, %v409_v25  ;;  %v564_v48 = vand.u32 4294901760, %v1146_v42  ;;  %v519_v57 = vsel %vm58_vm0, %v515_v51, 0 }
  0x14   :  { %v1015_v21 = vpop.eup %1014  ;;  %v60_v22 = vsel %vm58_vm0, %v55_v17, 0  ;;  %v107_v23 = vand.u32 4294901760, %v106_v18  ;;  %v364_v47 = vsel %vm58_vm0, %v360_v41, 0  ;;  %v1157_v60 = vsub.f32 %v673_v54, %v692_v55 }
  0x15   :  { %v256_v24 = vand.u32 4294901760, %v255_v19  ;;  %v79_v26 = vand.u32 4294901760, %v60_v22  ;;  %v48_v27 = vmul.f32 0.5, %v1015_v21  ;;  %v411_v40 = vand.u32 4294901760, %v410_v31 }
  0x16   :  { %108 = vmatpush.msra.mxu1 %v107_v23  ;;  %v383_v50 = vand.u32 4294901760, %v364_v47  ;;  %v565_v53 = vsub.f32 %v1146_v42, %v564_v48  ;;  %v538_v61 = vand.u32 4294901760, %v519_v57  ;;  %v669_v63 = vand.u32 2147483647, %v1006_v59 }
  0x17   :  { %257 = vmatpush.msrb.mxu3 %v256_v24  ;;  %v80_v29 = vsub.f32 %v60_v22, %v79_v26  ;;  %110 = vmatmul.f32.vlgmr.msra.gmra.mxu1 %v79_v26  ;;  %v49_v30 = vadd.f32 0.5, %v48_v27  ;;  %v720_v0 = vand.u32 4294901760, %v1157_v60  ;;  %v848_v7 = vand.u32 4294901760, %v829_v2 }
  0x18   :  { %202 = vmatpush.msrb.mxu1 %v77_v3  ;;  %v384_v56 = vsub.f32 %v364_v47, %v383_v50  ;;  %v566_v58 = vand.u32 4294901760, %v565_v53  ;;  %v539_v3 = vsub.f32 %v519_v57, %v538_v61  ;;  %v670_v6 = vsub.f32 1.0, %v669_v63 }
  0x19   :  { %134 = vmatmul.f32.vlgmr.msra.gmra.mxu2 %v80_v29  ;;  %v81_v34 = vand.u32 4294901760, %v80_v29  ;;  %v50_v35 = vmul.f32 %v49_v30, %v1125_v1  ;;  %v875_v13 = vsub.f32 %v829_v2, %v848_v7 }
  0x1a   :  { %303 = vmatpush.msra.mxu1 %v226_v5  ;;  %329 = vmatpush.msra.mxu2 %v254_v15  ;;  %v385_v62 = vand.u32 4294901760, %v384_v56  ;;  %v540_v9 = vand.u32 4294901760, %v539_v3  ;;  %v671_v12 = vmax.f32 %v670_v6, 0.0 }
  0x1b   :  { %158 = vmatmul.f32.vlgmr.msra.gmra.mxu3 %v81_v34  ;;  %v82_v36 = vsub.f32 %v80_v29, %v81_v34  ;;  %v209_v37 = vsel %vm58_vm0, %v50_v35, 0  ;;  %v876_v17 = vand.u32 4294901760, %v875_v13 }
  0x1c   :  { %v228_v39 = vand.u32 4294901760, %v209_v37  ;;  %351 = vmatpush.msra.mxu3 %v226_v5  ;;  %v386_v4 = vsub.f32 %v384_v56, %v385_v62  ;;  %v1007_v5 = vadd.f32 -2.0, %v1125_v1  ;;  %v541_v1 = vsub.f32 %v539_v3, %v540_v9 }
  0x1d   :  { %v83_v43 = vand.u32 4294901760, %v82_v36  ;;  %v877_v21 = vsub.f32 %v875_v13, %v876_v17 }
  0x1e   :  { %v229_v44 = vsub.f32 %v209_v37, %v228_v39  ;;  %v387_v10 = vand.u32 4294901760, %v386_v4  ;;  %v542_v18 = vand.u32 4294901760, %v541_v1 }
  0x1f   :  { %84 = vmatmul.f32.vlgmr.msra.gmra.mxu0 %v83_v43  ;;  %204 = vmatmul.f32.vlgmr.msrb.gmra.mxu1 %v79_v26  ;;  %v878_v24 = vand.u32 4294901760, %v877_v21 }
  0x20   :  { %v230_v46 = vand.u32 4294901760, %v229_v44  ;;  %280 = vmatpush.msra.mxu0 %v253_v11  ;;  %412 = vmatpush.msrb.mxu1 %v411_v40  ;;  %v825_v11 = vand.u32 2147483647, %v1007_v5 }
  0x22   :  { %v231_v49 = vsub.f32 %v229_v44, %v230_v46  ;;  %v826_v15 = vsub.f32 1.0, %v825_v11 }
  0x23   :  { %259 = vmatmul.f32.vlgmr.msrb.gmra.mxu3 %v228_v39 }
  0x24   :  { %v232_v52 = vand.u32 4294901760, %v231_v49  ;;  %458 = vmatpush.msrb.mxu3 %v1129_v8  ;;  %v827_v20 = vmax.f32 %v826_v15, 0.0 }
  0x26   :  { %233 = vmatmul.f32.vlgmr.msrb.gmra.mxu2 %v232_v52  ;;  %v831_v23 = vsel %vm58_vm0, %v827_v20, 0 }
  0x27   :  { %182 = vmatmul.f32.vlgmr.msrb.gmra.mxu0 %v79_v26  ;;  %435 = vmatpush.msrb.mxu2 %v1133_v16  ;;  %v675_v16 = vsel %vm58_vm0, %v671_v12, 0 }
  0x28   :  { %307 = vmatmul.f32.vlgmr.msra.gmra.mxu1 %v230_v46  ;;  %382 = vmatpush.msrb.mxu0 %v1129_v8  ;;  %v694_v19 = vand.u32 4294901760, %v675_v16 }
  0x29   :  { %506 = vmatpush.msra.mxu1 %v1129_v8  ;;  %v721_v8 = vsub.f32 %v1157_v60, %v720_v0 }
  0x2a   :  { %v695_v22 = vsub.f32 %v675_v16, %v694_v19 }
  0x2b   :  { %353 = vmatmul.f32.vlgmr.msra.gmra.mxu3 %v228_v39  ;;  %v722_v14 = vand.u32 4294901760, %v721_v8 }
  0x2c   :  { %567 = vmatpush.msra.mxu3 %v566_v58  ;;  %v696_v26 = vand.u32 4294901760, %v695_v22 }
  0x2e   :  { %331 = vmatmul.f32.vlgmr.msra.gmra.mxu2 %v228_v39  ;;  %v697_v28 = vsub.f32 %v695_v22, %v696_v26 }
  0x2f   :  { %283 = vmatmul.f32.vlgmr.msra.gmra.mxu0 %v229_v44  ;;  %537 = vmatpush.msra.mxu2 %v1140_v33 }
  0x30   :  { %414 = vmatmul.f32.vlgmr.msrb.gmra.mxu1 %v383_v50  ;;  %484 = vmatpush.msra.mxu0 %v409_v25  ;;  %v850_v25 = vand.u32 4294901760, %v831_v23  ;;  %v698_v30 = vand.u32 4294901760, %v697_v28 }
  0x31   :  { %613 = vmatpush.msrb.mxu1 %v1140_v33 }
  0x32   :  { %v851_v27 = vsub.f32 %v831_v23, %v850_v25 }
  0x33   :  { %462 = vmatmul.f32.vlgmr.msrb.gmra.mxu3 %v385_v62 }
  0x34   :  { %661 = vmatpush.msrb.mxu3 %v1140_v33  ;;  %v852_v29 = vand.u32 4294901760, %v851_v27 }
  0x36   :  { %438 = vmatmul.f32.vlgmr.msrb.gmra.mxu2 %v384_v56  ;;  %v853_v31 = vsub.f32 %v851_v27, %v852_v29 }
  0x37   :  { %388 = vmatmul.f32.vlgmr.msrb.gmra.mxu0 %v387_v10  ;;  %639 = vmatpush.msrb.mxu2 %v564_v48 }
  0x38   :  { %508 = vmatmul.f32.vlgmr.msra.gmra.mxu1 %v383_v50  ;;  %590 = vmatpush.msrb.mxu0 %v1146_v42  ;;  %v854_v32 = vand.u32 4294901760, %v853_v31 }
  0x39   :  { %723 = vmatpush.msra.mxu1 %v722_v14 }
  0x3b   :  { %569 = vmatmul.f32.vlgmr.msra.gmra.mxu3 %v538_v61 }
  0x3c   :  { %769 = vmatpush.msra.mxu3 %v692_v55 }
  0x3e   :  { %543 = vmatmul.f32.vlgmr.msra.gmra.mxu2 %v542_v18 }
  0x3f   :  { %486 = vmatmul.f32.vlgmr.msra.gmra.mxu0 %v383_v50  ;;  %746 = vmatpush.msra.mxu2 %v1157_v60 }
  0x40   :  { %617 = vmatmul.f32.vlgmr.msrb.gmra.mxu1 %v540_v9  ;;  %693 = vmatpush.msra.mxu0 %v692_v55 }
  0x41   :  { %817 = vmatpush.msrb.mxu1 %v692_v55 }
  0x43   :  { %663 = vmatmul.f32.vlgmr.msrb.gmra.mxu3 %v538_v61 }
  0x44   :  { %879 = vmatpush.msrb.mxu3 %v878_v24 }
  0x46   :  { %641 = vmatmul.f32.vlgmr.msrb.gmra.mxu2 %v538_v61 }
  0x47   :  { %593 = vmatmul.f32.vlgmr.msrb.gmra.mxu0 %v539_v3  ;;  %849 = vmatpush.msrb.mxu2 %v848_v7 }
  0x48   :  { %725 = vmatmul.f32.vlgmr.msra.gmra.mxu1 %v694_v19  ;;  %795 = vmatpush.msrb.mxu0 %v720_v0 }
  0x49   :  { %925 = vmatpush.msra.mxu1 %v848_v7 }
  0x4b   :  { %773 = vmatmul.f32.vlgmr.msra.gmra.mxu3 %v696_v26 }
  0x4c   :  { %973 = vmatpush.msra.mxu3 %v848_v7 }
  0x4e   :  { %749 = vmatmul.f32.vlgmr.msra.gmra.mxu2 %v695_v22 }
  0x4f   :  { %699 = vmatmul.f32.vlgmr.msra.gmra.mxu0 %v698_v30  ;;  %951 = vmatpush.msra.mxu2 %v876_v17 }
  0x50   :  { %902 = vmatpush.msra.mxu0 %v875_v13  ;;  %819 = vmatmul.f32.vlgmr.msrb.gmra.mxu1 %v694_v19 }
  0x53   :  { %881 = vmatmul.f32.vlgmr.msrb.gmra.mxu3 %v850_v25 }
  0x56   :  { %855 = vmatmul.f32.vlgmr.msrb.gmra.mxu2 %v854_v32 }
  0x57   :  { %797 = vmatmul.f32.vlgmr.msrb.gmra.mxu0 %v694_v19 }
  0x58   :  { %929 = vmatmul.f32.vlgmr.msra.gmra.mxu1 %v852_v29 }
  0x5b   :  { %975 = vmatmul.f32.vlgmr.msra.gmra.mxu3 %v850_v25 }
  0x5e   :  { %953 = vmatmul.f32.vlgmr.msra.gmra.mxu2 %v850_v25 }
  0x5f   :  { %905 = vmatmul.f32.vlgmr.msra.gmra.mxu0 %v851_v27 }
  0x94   :  { %v111_v33 = vpop.f32.mrf.mxu1 }
  0x9c   :  { %v85_v34 = vpop.f32.mrf.mxu0  ;;  %v205_v35 = vpop.f32.mrf.mxu1 }
  0x9d   :  { %v135_v37 = vpop.f32.mrf.mxu2  ;;  %v112_v48 = vadd.f32 %v111_v33, %v85_v34 }
  0x9e   :  { %v159_v36 = vpop.f32.mrf.mxu3 }
  0x9f   :  { %v136_v51 = vadd.f32 %v135_v37, %v112_v48 }
  0xa1   :  { %v160_v53 = vadd.f32 %v159_v36, %v136_v51 }
  0xa4   :  { %v183_v38 = vpop.f32.mrf.mxu0 }
  0xa5   :  { %v308_v39 = vpop.f32.mrf.mxu1  ;;  %v184_v57 = vadd.f32 %v183_v38, %v160_v53 }
  0xa6   :  { %v260_v40 = vpop.f32.mrf.mxu3 }
  0xa7   :  { %v206_v59 = vadd.f32 %v205_v35, %v184_v57 }
  0xa9   :  { %v234_v41 = vpop.f32.mrf.mxu2 }
  0xaa   :  { %v235_v63 = vadd.f32 %v234_v41, %v206_v59 }
  0xac   :  { %v284_v42 = vpop.f32.mrf.mxu0  ;;  %v261_v2 = vadd.f32 %v260_v40, %v235_v63 }
  0xad   :  { %v415_v43 = vpop.f32.mrf.mxu1 }
  0xae   :  { %v354_v44 = vpop.f32.mrf.mxu3  ;;  %v285_v8 = vadd.f32 %v284_v42, %v261_v2 }
  0xb0   :  { %v309_v1 = vadd.f32 %v308_v39, %v285_v8  ;;  %v1013_v39 = vld [vmem:[%s1179_s2] ss:$0 sm:$0xff] }
  0xb1   :  { %v332_v45 = vpop.f32.mrf.mxu2 }
  0xb2   :  { %v333_v20 = vadd.f32 %v332_v45, %v309_v1 }
  0xb4   :  { %v389_v46 = vpop.f32.mrf.mxu0  ;;  %v355_v28 = vadd.f32 %v354_v44, %v333_v20 }
  0xb5   :  { %v509_v47 = vpop.f32.mrf.mxu1  ;;  %v416_v3 = vadd.f32 %v415_v43, %v389_v46 }
  0xb6   :  { %v463_v49 = vpop.f32.mrf.mxu3 }
  0xb9   :  { %v439_v50 = vpop.f32.mrf.mxu2 }
  0xba   :  { %v440_v6 = vadd.f32 %v439_v50, %v416_v3 }
  0xbc   :  { %v487_v52 = vpop.f32.mrf.mxu0  ;;  %v464_v12 = vadd.f32 %v463_v49, %v440_v6 }
  0xbd   :  { %v618_v55 = vpop.f32.mrf.mxu1 }
  0xbe   :  { %v570_v54 = vpop.f32.mrf.mxu3  ;;  %v488_v17 = vadd.f32 %v487_v52, %v464_v12 }
  0xc0   :  { %v510_v23 = vadd.f32 %v509_v47, %v488_v17 }
  0xc1   :  { %v544_v56 = vpop.f32.mrf.mxu2 }
  0xc2   :  { %v571_v4 = vadd.f32 %v570_v54, %v544_v56  ;;  %v512_v31 = vadd.f32 %v510_v23, %v355_v28 }
  0xc4   :  { %v594_v58 = vpop.f32.mrf.mxu0 }
  0xc5   :  { %v726_v61 = vpop.f32.mrf.mxu1  ;;  %v595_v9 = vadd.f32 %v594_v58, %v571_v4 }
  0xc6   :  { %v664_v60 = vpop.f32.mrf.mxu3 }
  0xc7   :  { %v619_v15 = vadd.f32 %v618_v55, %v595_v9 }
  0xc9   :  { %v642_v62 = vpop.f32.mrf.mxu2 }
  0xca   :  { %v643_v21 = vadd.f32 %v642_v62, %v619_v15 }
  0xcc   :  { %v700_v0 = vpop.f32.mrf.mxu0  ;;  %v665_v29 = vadd.f32 %v664_v60, %v643_v21 }
  0xcd   :  { %v727_v10 = vadd.f32 %v726_v61, %v700_v0  ;;  %v820_v11 = vpop.f32.mrf.mxu1 }
  0xce   :  { %v774_v5 = vpop.f32.mrf.mxu3  ;;  %v667_v35 = vadd.f32 %v665_v29, %v512_v31 }
  0xd1   :  { %v750_v7 = vpop.f32.mrf.mxu2 }
  0xd2   :  { %v751_v13 = vadd.f32 %v750_v7, %v727_v10 }
  0xd4   :  { %v798_v14 = vpop.f32.mrf.mxu0  ;;  %v775_v18 = vadd.f32 %v774_v5, %v751_v13 }
  0xd5   :  { %v930_v26 = vpop.f32.mrf.mxu1 }
  0xd6   :  { %v882_v16 = vpop.f32.mrf.mxu3  ;;  %v799_v24 = vadd.f32 %v798_v14, %v775_v18 }
  0xd8   :  { %v821_v32 = vadd.f32 %v820_v11, %v799_v24 }
  0xd9   :  { %v856_v19 = vpop.f32.mrf.mxu2 }
  0xda   :  { %v883_v22 = vadd.f32 %v882_v16, %v856_v19  ;;  %v823_v37 = vadd.f32 %v821_v32, %v667_v35 }
  0xdc   :  { %v906_v25 = vpop.f32.mrf.mxu0 }
  0xdd   :  { %v907_v27 = vadd.f32 %v906_v25, %v883_v22 }
  0xde   :  { %v976_v34 = vpop.f32.mrf.mxu3 }
  0xdf   :  { %v931_v30 = vadd.f32 %v930_v26, %v907_v27 }
  0xe1   :  { %v954_v33 = vpop.f32.mrf.mxu2 }
  0xe2   :  { %v955_v36 = vadd.f32 %v954_v33, %v931_v30 }
  0xe4   :  { %v977_v38 = vadd.f32 %v976_v34, %v955_v36 }
  0xe6   :  { %v979_v40 = vadd.f32 %v977_v38, %v823_v37 }
  0xe8   :  { %v984_v41 = vadd.f32 %v1013_v39, %v979_v40 }
  0xea   :  { %985 = vst [vmem:[#allocation7] sm:$0xff] %v984_v41 }
  0xeb   :  { %996 = dma.vmem_to_hbm [thread:$0]  %s992_s25, 128, %s994_s28, [#allocation4]  }
  0xec   :  { %1092 = dma.done.wait [#allocation4], 128  }
  0xed   :  { %1093 = vsyncadd [#allocation4], 4294967168 }
  0xee   :  { %1001 = vsyncpa [#allocation3], 1 }
  0xef   :  { %1002 = vsyncpa [#allocation6], 1 }
  0xf0   :  { %1003 = vsyncpa [#allocation4], 1 }

</bundles_post_ra>
